<compile_context>
chip_gen: v7x
topology: tpu7x:2x2x1
jax: 0.10.0
libtpu: 0.0.40
codegen_flags: <defaults>
</compile_context>

<pallas_src>
import jax
import jax.numpy as jnp
from jax import lax
from jax.experimental import pallas as pl
from jax.experimental.pallas import tpu as pltpu


def _pick_blocking(B):
    """Returns (BBh, num_sub): rows per sub-block (multiple of 8) and number of
    interleaved sub-blocks per grid block.  Aims for >=2 grid blocks when the
    batch allows (v7x megacore) while keeping sub-blocks sublane-aligned."""
    if B <= 8:
        return 8, 1                       # toy batch: one sub-block, grid=(1,)
    BBh = min(64, max(8, (-(-B // 32) * 32) // 4))
    return BBh, 2


def _make_kernel(T, BBh, num_sub, H):
    H3 = 3 * H

    def gate_act(g):
        # gate columns pre-permuted to [i | f | o | g]:
        # one sigmoid over [0:3H], one tanh over [3H:4H]  (half the EUP work)
        sg = jax.nn.sigmoid(g[:, :H3])
        gg = jnp.tanh(g[:, H3:])
        return sg[:, :H], sg[:, H:2 * H], sg[:, 2 * H:H3], gg   # i, f, o, g

    def kernel(x_ref, wihf_ref, bf_ref, whh_ref, wihb_ref, bb_ref,
               w1_ref, b1_ref, w2_ref, b2_ref, o_ref):
        # ---- hoisted FORWARD input projection for all T steps --------------
        # x slab is already (num_sub*T*BBh, D) contiguous: no reshape needed.
        gx = jnp.dot(x_ref[...], wihf_ref[...],
                     preferred_element_type=jnp.float32) + bf_ref[...]

        whh = whh_ref[...]
        mm_dt = whh.dtype        # bf16 or f32 matmul operands; accum stays f32

        # ---- forward recurrence: num_sub independent sub-blocks advanced in
        #      the same unrolled t-loop (sub-block A's h@W_hh overlaps sub-
        #      block B's sigmoid/tanh in the EUP) ---------------------------
        hs = [jnp.zeros((BBh, H), jnp.float32) for _ in range(num_sub)]
        cs = [jnp.zeros((BBh, H), jnp.float32) for _ in range(num_sub)]
        for t in range(T):                     # static unroll: T is trace-time const
            for s in range(num_sub):
                row = s * T * BBh + t * BBh
                g = gx[row:row + BBh] + jnp.dot(
                    hs[s].astype(mm_dt), whh, preferred_element_type=jnp.float32)
                i_g, f_g, o_g, g_g = gate_act(g)
                cs[s] = f_g * cs[s] + i_g * g_g
                hs[s] = o_g * jnp.tanh(cs[s])
        h_f = jnp.concatenate(hs, axis=0)                       # (BB, H)

        # ---- backward direction: one step on x[T-1] from zero state --------
        # (input projection computed ONLY for the last time slice)
        x_last = jnp.concatenate(
            [x_ref[s * T * BBh + (T - 1) * BBh: s * T * BBh + T * BBh, :]
             for s in range(num_sub)], axis=0)                  # (BB, D)
        gb = jnp.dot(x_last, wihb_ref[...],
                     preferred_element_type=jnp.float32) + bb_ref[...]
        i_b, f_b, o_b, g_b = gate_act(gb)
        h_b = o_b * jnp.tanh(i_b * g_b)        # c_prev = 0  =>  c = i * g

        # ---- head: BatchNorm folded into w1/b1; w1 split per direction -----
        z = (jnp.dot(h_f.astype(mm_dt), w1_ref[0], preferred_element_type=jnp.float32)
             + jnp.dot(h_b.astype(mm_dt), w1_ref[1], preferred_element_type=jnp.float32)
             + b1_ref[...])
        z = jnp.maximum(z, 0.0)                # ReLU; AlphaDropout = identity in eval
        logits = jnp.dot(z.astype(mm_dt), w2_ref[...],
                         preferred_element_type=jnp.float32) + b2_ref[...]
        o_ref[...] = jax.nn.sigmoid(logits)    # lane-dense (BB, 128k) store

    return kernel


def lstm_module_forward(x, params, compute_dtype=jnp.float32):
    """x: (B, input_dim, T) float32 -> (B, num_classes) float32.

    compute_dtype: dtype of x / weight matmul operands (f32 or bf16); biases,
    accumulation and all elementwise recurrence state stay f32."""
    B, D, T = x.shape
    H = params["whh_f"].shape[0]
    C = params["w2"].shape[1]

    BBh, num_sub = _pick_blocking(B)
    BB = BBh * num_sub                             # batch rows per grid block
    B_pad = -(-B // BB) * BB
    nblk = B_pad // BB
    C_pad = -(-C // 128) * 128                     # lane-dense final store
    R = num_sub * T * BBh                          # x-slab rows per grid block
    cd = compute_dtype

    # gate-column permutation: PyTorch [i,f,g,o] -> [i,f,o,g]
    perm = jnp.concatenate([jnp.arange(0, 2 * H),
                            jnp.arange(3 * H, 4 * H),
                            jnp.arange(2 * H, 3 * H)])

    def reorder(w):
        return jnp.take(w, perm, axis=-1)

    wih_f = reorder(params["wih_f"]).astype(cd)                  # (D, 4H)
    whh_f = reorder(params["whh_f"]).astype(cd)                  # (H, 4H)
    b_f = reorder(params["b_f"]).astype(jnp.float32)             # (1, 4H)
    wih_b = reorder(params["wih_b"]).astype(cd)                  # (D, 4H)
    b_b = reorder(params["b_b"]).astype(jnp.float32)             # (1, 4H)

    # fold eval-mode BatchNorm into the first head layer; split per direction
    w1 = params["w1"] * params["bn_scale"]                       # (2H, H)
    b1 = (params["b1"] * params["bn_scale"]
          + params["bn_shift"]).astype(jnp.float32)              # (1, H)
    w1_pack = jnp.stack([w1[:H], w1[H:]], axis=0).astype(cd)     # (2, H, H)

    # lane-pad the classifier so the final store is a full 128-lane vreg
    w2 = jnp.pad(params["w2"], ((0, 0), (0, C_pad - C))).astype(cd)
    b2 = jnp.pad(params["b2"], ((0, 0), (0, C_pad - C))).astype(jnp.float32)

    # x: (B, D, T) -> per-grid-block contiguous slabs, rows ordered
    # (sub_block, t, row):  (nblk, num_sub*T*BBh, D).  Each grid step DMAs one
    # dense slab; the kernel never reshapes it.
    x_btd = jnp.transpose(x, (0, 2, 1)).astype(jnp.float32)      # (B, T, D)
    x_btd = jnp.pad(x_btd, ((0, B_pad - B), (0, 0), (0, 0)))
    x_blk = (x_btd.reshape(nblk, num_sub, BBh, T, D)
             .transpose(0, 1, 3, 2, 4)
             .reshape(nblk, R, D)).astype(cd)

    kernel = _make_kernel(T, BBh, num_sub, H)
    out = pl.pallas_call(
        kernel,
        out_shape=jax.ShapeDtypeStruct((B_pad, C_pad), jnp.float32),
        grid=(nblk,),
        in_specs=[
            pl.BlockSpec((None, R, D), lambda i: (i, 0, 0)),   # x slab (contiguous)
            pl.BlockSpec((D, 4 * H), lambda i: (0, 0)),        # W_ih fwd
            pl.BlockSpec((1, 4 * H), lambda i: (0, 0)),        # bias fwd (b_ih+b_hh)
            pl.BlockSpec((H, 4 * H), lambda i: (0, 0)),        # W_hh fwd
            pl.BlockSpec((D, 4 * H), lambda i: (0, 0)),        # W_ih bwd (t=T-1 only)
            pl.BlockSpec((1, 4 * H), lambda i: (0, 0)),        # bias bwd
            pl.BlockSpec((2, H, H), lambda i: (0, 0, 0)),      # w1 (BN-folded, per-dir)
            pl.BlockSpec((1, H), lambda i: (0, 0)),            # b1 (BN-folded)
            pl.BlockSpec((H, C_pad), lambda i: (0, 0)),        # w2 (lane-padded)
            pl.BlockSpec((1, C_pad), lambda i: (0, 0)),        # b2 (lane-padded)
        ],
        out_specs=pl.BlockSpec((BB, C_pad), lambda i: (i, 0)),
        compiler_params=pltpu.CompilerParams(
            dimension_semantics=("parallel",),      # v7x: shard batch blocks over TCs
            vmem_limit_bytes=32 * 1024 * 1024),
    )(x_blk, wih_f, b_f, whh_f, wih_b, b_b, w1_pack, b1, w2, b2)

    return out[:B, :C]


def init_params(key, input_dim, hidden_dim, num_classes):
    """Deterministic PyTorch-style uniform init (weights stored pre-transposed,
    gate columns in PyTorch order [i,f,g,o])."""
    ks = jax.random.split(key, 16)
    H, D, C = hidden_dim, input_dim, num_classes
    k_lstm = 1.0 / jnp.sqrt(H)

    def u(k, shape, bound):
        return jax.random.uniform(k, shape, jnp.float32, -bound, bound)

    params = dict(
        wih_f=u(ks[0], (D, 4 * H), k_lstm),
        whh_f=u(ks[1], (H, 4 * H), k_lstm),
        b_f=u(ks[2], (1, 4 * H), k_lstm) + u(ks[3], (1, 4 * H), k_lstm),  # b_ih+b_hh
        wih_b=u(ks[4], (D, 4 * H), k_lstm),
        whh_b=u(ks[5], (H, 4 * H), k_lstm),   # unused: bwd recurrent term is 0 at t=T-1
        b_b=u(ks[6], (1, 4 * H), k_lstm) + u(ks[7], (1, 4 * H), k_lstm),
        w1=u(ks[8], (2 * H, H), 1.0 / jnp.sqrt(2 * H)),
        b1=u(ks[9], (1, H), 1.0 / jnp.sqrt(2 * H)),
        w2=u(ks[10], (H, C), 1.0 / jnp.sqrt(H)),
        b2=u(ks[11], (1, C), 1.0 / jnp.sqrt(H)),
    )
    # eval-mode BatchNorm1d: gamma=1, beta=0, running_mean=0, running_var=1
    eps = 1e-5
    params["bn_scale"] = jnp.full((1, H), 1.0 / jnp.sqrt(1.0 + eps), jnp.float32)
    params["bn_shift"] = jnp.zeros((1, H), jnp.float32)
    return params


def reference_forward(x, params):
    """Pure-JAX f32 reference of the same forward pass (PyTorch gate order)."""
    H = params["whh_f"].shape[0]
    x_btd = jnp.transpose(x, (0, 2, 1))                   # (B, T, D)

    def cell(carry, x_t, wih, whh, b):
        h, c = carry
        g = x_t @ wih + h @ whh + b
        i = jax.nn.sigmoid(g[:, 0 * H:1 * H])
        f = jax.nn.sigmoid(g[:, 1 * H:2 * H])
        gg = jnp.tanh(g[:, 2 * H:3 * H])
        o = jax.nn.sigmoid(g[:, 3 * H:4 * H])
        c = f * c + i * gg
        h = o * jnp.tanh(c)
        return (h, c), h

    B = x.shape[0]
    z0 = (jnp.zeros((B, H)), jnp.zeros((B, H)))
    (h_f, _), _ = lax.scan(
        lambda c, xt: cell(c, xt, params["wih_f"], params["whh_f"], params["b_f"]),
        z0, jnp.swapaxes(x_btd, 0, 1))
    (h_b, _), _ = cell(z0, x_btd[:, -1], params["wih_b"], params["whh_b"], params["b_b"])
    feat = jnp.concatenate([h_f, h_b], axis=-1)
    z = feat @ params["w1"] + params["b1"]
    z = jnp.maximum(z * params["bn_scale"] + params["bn_shift"], 0.0)
    return jax.nn.sigmoid(z @ params["w2"] + params["b2"])


if __name__ == "__main__":
    D, T, H, C = 16, 8, 32, 30    # input_dim, seq_len, hidden_dim, num_classes
    key = jax.random.PRNGKey(0)

    # B=4  -> single sub-block, grid=(1,)           (tiny-batch path)
    # B=24 -> two interleaved sub-blocks, grid=(2,), batch padding exercised
    for B in (4, 24):
        kx, kp = jax.random.split(jax.random.fold_in(key, B))
        x = jax.random.normal(kx, (B, D, T), jnp.float32)   # module input (B, input_dim, T)
        params = init_params(kp, D, H, C)

        ref = reference_forward(x, params)

        out = jax.block_until_ready(lstm_module_forward(x, params))
        assert out.shape == (B, C)
        assert jnp.allclose(out, ref, atol=1e-3, rtol=1e-3)

        # bf16 weight/x operands (f32 accumulation & state): halves DMA bytes,
        # doubles MXU rate on v6e/v7x.
        out_bf16 = jax.block_until_ready(
            lstm_module_forward(x, params, compute_dtype=jnp.bfloat16))
        assert jnp.allclose(out_bf16, ref, atol=2e-2, rtol=2e-2)

    print("KERNEL_OK")
</pallas_src>

<mosaic_0001>
module attributes {stable_mosaic.version = 11 : i64} {
  func.func @kernel(%arg0: i32, %arg1: memref<1x64x16xf32, #tpu.memory_space<vmem>>, %arg2: memref<16x128xf32, #tpu.memory_space<vmem>>, %arg3: memref<1x128xf32, #tpu.memory_space<vmem>>, %arg4: memref<32x128xf32, #tpu.memory_space<vmem>>, %arg5: memref<16x128xf32, #tpu.memory_space<vmem>>, %arg6: memref<1x128xf32, #tpu.memory_space<vmem>>, %arg7: memref<2x32x32xf32, #tpu.memory_space<vmem>>, %arg8: memref<1x32xf32, #tpu.memory_space<vmem>>, %arg9: memref<32x128xf32, #tpu.memory_space<vmem>>, %arg10: memref<1x128xf32, #tpu.memory_space<vmem>>, %arg11: memref<8x128xf32, #tpu.memory_space<vmem>>) attributes {dimension_semantics = [#tpu.dimension_semantics<parallel>], iteration_bounds = array<i64: 1>, scalar_prefetch = 0 : i64, scratch_operands = 0 : i64, tpu.core_type = #tpu.core_type<tc>, window_params = [{transform_indices = @transform_0, window_bounds = array<i64: 1, 64, 16>}, {pipeline_mode = #tpu.pipeline_mode<synchronous>, transform_indices = @transform_1, window_bounds = array<i64: 16, 128>}, {pipeline_mode = #tpu.pipeline_mode<synchronous>, transform_indices = @transform_2, window_bounds = array<i64: 1, 128>}, {pipeline_mode = #tpu.pipeline_mode<synchronous>, transform_indices = @transform_3, window_bounds = array<i64: 32, 128>}, {pipeline_mode = #tpu.pipeline_mode<synchronous>, transform_indices = @transform_4, window_bounds = array<i64: 16, 128>}, {pipeline_mode = #tpu.pipeline_mode<synchronous>, transform_indices = @transform_5, window_bounds = array<i64: 1, 128>}, {pipeline_mode = #tpu.pipeline_mode<synchronous>, transform_indices = @transform_6, window_bounds = array<i64: 2, 32, 32>}, {pipeline_mode = #tpu.pipeline_mode<synchronous>, transform_indices = @transform_7, window_bounds = array<i64: 1, 32>}, {pipeline_mode = #tpu.pipeline_mode<synchronous>, transform_indices = @transform_8, window_bounds = array<i64: 32, 128>}, {pipeline_mode = #tpu.pipeline_mode<synchronous>, transform_indices = @transform_9, window_bounds = array<i64: 1, 128>}, {transform_indices = @transform_10, window_bounds = array<i64: 8, 128>}]} {
    %c0 = arith.constant 0 : index
    %c0_0 = arith.constant 0 : index
    %c0_1 = arith.constant 0 : index
    %0 = vector.load %arg1[%c0, %c0_0, %c0_1] : memref<1x64x16xf32, #tpu.memory_space<vmem>>, vector<1x64x16xf32>
    %1 = vector.shape_cast %0 : vector<1x64x16xf32> to vector<64x16xf32>
    %c0_2 = arith.constant 0 : index
    %c0_3 = arith.constant 0 : index
    %2 = vector.load %arg2[%c0_2, %c0_3] : memref<16x128xf32, #tpu.memory_space<vmem>>, vector<16x128xf32>
    %cst = arith.constant dense<0.000000e+00> : vector<64x128xf32>
    %3 = tpu.matmul %1, %2, %cst {dimension_numbers = #tpu.dot_dimension_numbers<[1], [0], [0], [1], [0, 0, 1, 1], [], []>} : vector<64x16xf32>, vector<16x128xf32>, vector<64x128xf32> -> vector<64x128xf32>
    %c0_4 = arith.constant 0 : index
    %c0_5 = arith.constant 0 : index
    %4 = vector.load %arg3[%c0_4, %c0_5] : memref<1x128xf32, #tpu.memory_space<vmem>>, vector<1x128xf32>
    %5 = vector.broadcast %4 : vector<1x128xf32> to vector<64x128xf32>
    %6 = arith.addf %3, %5 : vector<64x128xf32>
    %c0_6 = arith.constant 0 : index
    %c0_7 = arith.constant 0 : index
    %7 = vector.load %arg4[%c0_6, %c0_7] : memref<32x128xf32, #tpu.memory_space<vmem>>, vector<32x128xf32>
    %cst_8 = arith.constant 0.000000e+00 : f32
    %8 = vector.broadcast %cst_8 : f32 to vector<8x32xf32>
    %cst_9 = arith.constant 0.000000e+00 : f32
    %9 = vector.broadcast %cst_9 : f32 to vector<8x32xf32>
    %10 = vector.extract_strided_slice %6 {offsets = [0, 0], sizes = [8, 128], strides = [1, 1]} : vector<64x128xf32> to vector<8x128xf32>
    %cst_10 = arith.constant dense<0.000000e+00> : vector<8x128xf32>
    %11 = tpu.matmul %8, %7, %cst_10 {dimension_numbers = #tpu.dot_dimension_numbers<[1], [0], [0], [1], [0, 0, 1, 1], [], []>} : vector<8x32xf32>, vector<32x128xf32>, vector<8x128xf32> -> vector<8x128xf32>
    %12 = arith.addf %10, %11 : vector<8x128xf32>
    %13 = vector.extract_strided_slice %12 {offsets = [0, 0], sizes = [8, 96], strides = [1, 1]} : vector<8x128xf32> to vector<8x96xf32>
    %14 = arith.negf %13 : vector<8x96xf32>
    %15 = math.exp %14 : vector<8x96xf32>
    %cst_11 = arith.constant 1.000000e+00 : f32
    %16 = vector.broadcast %cst_11 : f32 to vector<8x96xf32>
    %17 = arith.addf %16, %15 : vector<8x96xf32>
    %18 = arith.divf %16, %17 : vector<8x96xf32>
    %19 = vector.extract_strided_slice %12 {offsets = [0, 96], sizes = [8, 32], strides = [1, 1]} : vector<8x128xf32> to vector<8x32xf32>
    %20 = math.tanh %19 : vector<8x32xf32>
    %21 = vector.extract_strided_slice %18 {offsets = [0, 0], sizes = [8, 32], strides = [1, 1]} : vector<8x96xf32> to vector<8x32xf32>
    %22 = vector.extract_strided_slice %18 {offsets = [0, 32], sizes = [8, 32], strides = [1, 1]} : vector<8x96xf32> to vector<8x32xf32>
    %23 = vector.extract_strided_slice %18 {offsets = [0, 64], sizes = [8, 32], strides = [1, 1]} : vector<8x96xf32> to vector<8x32xf32>
    %24 = arith.mulf %22, %9 : vector<8x32xf32>
    %25 = arith.mulf %21, %20 : vector<8x32xf32>
    %26 = arith.addf %24, %25 : vector<8x32xf32>
    %27 = math.tanh %26 : vector<8x32xf32>
    %28 = arith.mulf %23, %27 : vector<8x32xf32>
    %29 = vector.extract_strided_slice %6 {offsets = [8, 0], sizes = [8, 128], strides = [1, 1]} : vector<64x128xf32> to vector<8x128xf32>
    %cst_12 = arith.constant dense<0.000000e+00> : vector<8x128xf32>
    %30 = tpu.matmul %28, %7, %cst_12 {dimension_numbers = #tpu.dot_dimension_numbers<[1], [0], [0], [1], [0, 0, 1, 1], [], []>} : vector<8x32xf32>, vector<32x128xf32>, vector<8x128xf32> -> vector<8x128xf32>
    %31 = arith.addf %29, %30 : vector<8x128xf32>
    %32 = vector.extract_strided_slice %31 {offsets = [0, 0], sizes = [8, 96], strides = [1, 1]} : vector<8x128xf32> to vector<8x96xf32>
    %33 = arith.negf %32 : vector<8x96xf32>
    %34 = math.exp %33 : vector<8x96xf32>
    %cst_13 = arith.constant 1.000000e+00 : f32
    %35 = vector.broadcast %cst_13 : f32 to vector<8x96xf32>
    %36 = arith.addf %35, %34 : vector<8x96xf32>
    %37 = arith.divf %35, %36 : vector<8x96xf32>
    %38 = vector.extract_strided_slice %31 {offsets = [0, 96], sizes = [8, 32], strides = [1, 1]} : vector<8x128xf32> to vector<8x32xf32>
    %39 = math.tanh %38 : vector<8x32xf32>
    %40 = vector.extract_strided_slice %37 {offsets = [0, 0], sizes = [8, 32], strides = [1, 1]} : vector<8x96xf32> to vector<8x32xf32>
    %41 = vector.extract_strided_slice %37 {offsets = [0, 32], sizes = [8, 32], strides = [1, 1]} : vector<8x96xf32> to vector<8x32xf32>
    %42 = vector.extract_strided_slice %37 {offsets = [0, 64], sizes = [8, 32], strides = [1, 1]} : vector<8x96xf32> to vector<8x32xf32>
    %43 = arith.mulf %41, %26 : vector<8x32xf32>
    %44 = arith.mulf %40, %39 : vector<8x32xf32>
    %45 = arith.addf %43, %44 : vector<8x32xf32>
    %46 = math.tanh %45 : vector<8x32xf32>
    %47 = arith.mulf %42, %46 : vector<8x32xf32>
    %48 = vector.extract_strided_slice %6 {offsets = [16, 0], sizes = [8, 128], strides = [1, 1]} : vector<64x128xf32> to vector<8x128xf32>
    %cst_14 = arith.constant dense<0.000000e+00> : vector<8x128xf32>
    %49 = tpu.matmul %47, %7, %cst_14 {dimension_numbers = #tpu.dot_dimension_numbers<[1], [0], [0], [1], [0, 0, 1, 1], [], []>} : vector<8x32xf32>, vector<32x128xf32>, vector<8x128xf32> -> vector<8x128xf32>
    %50 = arith.addf %48, %49 : vector<8x128xf32>
    %51 = vector.extract_strided_slice %50 {offsets = [0, 0], sizes = [8, 96], strides = [1, 1]} : vector<8x128xf32> to vector<8x96xf32>
    %52 = arith.negf %51 : vector<8x96xf32>
    %53 = math.exp %52 : vector<8x96xf32>
    %cst_15 = arith.constant 1.000000e+00 : f32
    %54 = vector.broadcast %cst_15 : f32 to vector<8x96xf32>
    %55 = arith.addf %54, %53 : vector<8x96xf32>
    %56 = arith.divf %54, %55 : vector<8x96xf32>
    %57 = vector.extract_strided_slice %50 {offsets = [0, 96], sizes = [8, 32], strides = [1, 1]} : vector<8x128xf32> to vector<8x32xf32>
    %58 = math.tanh %57 : vector<8x32xf32>
    %59 = vector.extract_strided_slice %56 {offsets = [0, 0], sizes = [8, 32], strides = [1, 1]} : vector<8x96xf32> to vector<8x32xf32>
    %60 = vector.extract_strided_slice %56 {offsets = [0, 32], sizes = [8, 32], strides = [1, 1]} : vector<8x96xf32> to vector<8x32xf32>
    %61 = vector.extract_strided_slice %56 {offsets = [0, 64], sizes = [8, 32], strides = [1, 1]} : vector<8x96xf32> to vector<8x32xf32>
    %62 = arith.mulf %60, %45 : vector<8x32xf32>
    %63 = arith.mulf %59, %58 : vector<8x32xf32>
    %64 = arith.addf %62, %63 : vector<8x32xf32>
    %65 = math.tanh %64 : vector<8x32xf32>
    %66 = arith.mulf %61, %65 : vector<8x32xf32>
    %67 = vector.extract_strided_slice %6 {offsets = [24, 0], sizes = [8, 128], strides = [1, 1]} : vector<64x128xf32> to vector<8x128xf32>
    %cst_16 = arith.constant dense<0.000000e+00> : vector<8x128xf32>
    %68 = tpu.matmul %66, %7, %cst_16 {dimension_numbers = #tpu.dot_dimension_numbers<[1], [0], [0], [1], [0, 0, 1, 1], [], []>} : vector<8x32xf32>, vector<32x128xf32>, vector<8x128xf32> -> vector<8x128xf32>
    %69 = arith.addf %67, %68 : vector<8x128xf32>
    %70 = vector.extract_strided_slice %69 {offsets = [0, 0], sizes = [8, 96], strides = [1, 1]} : vector<8x128xf32> to vector<8x96xf32>
    %71 = arith.negf %70 : vector<8x96xf32>
    %72 = math.exp %71 : vector<8x96xf32>
    %cst_17 = arith.constant 1.000000e+00 : f32
    %73 = vector.broadcast %cst_17 : f32 to vector<8x96xf32>
    %74 = arith.addf %73, %72 : vector<8x96xf32>
    %75 = arith.divf %73, %74 : vector<8x96xf32>
    %76 = vector.extract_strided_slice %69 {offsets = [0, 96], sizes = [8, 32], strides = [1, 1]} : vector<8x128xf32> to vector<8x32xf32>
    %77 = math.tanh %76 : vector<8x32xf32>
    %78 = vector.extract_strided_slice %75 {offsets = [0, 0], sizes = [8, 32], strides = [1, 1]} : vector<8x96xf32> to vector<8x32xf32>
    %79 = vector.extract_strided_slice %75 {offsets = [0, 32], sizes = [8, 32], strides = [1, 1]} : vector<8x96xf32> to vector<8x32xf32>
    %80 = vector.extract_strided_slice %75 {offsets = [0, 64], sizes = [8, 32], strides = [1, 1]} : vector<8x96xf32> to vector<8x32xf32>
    %81 = arith.mulf %79, %64 : vector<8x32xf32>
    %82 = arith.mulf %78, %77 : vector<8x32xf32>
    %83 = arith.addf %81, %82 : vector<8x32xf32>
    %84 = math.tanh %83 : vector<8x32xf32>
    %85 = arith.mulf %80, %84 : vector<8x32xf32>
    %86 = vector.extract_strided_slice %6 {offsets = [32, 0], sizes = [8, 128], strides = [1, 1]} : vector<64x128xf32> to vector<8x128xf32>
    %cst_18 = arith.constant dense<0.000000e+00> : vector<8x128xf32>
    %87 = tpu.matmul %85, %7, %cst_18 {dimension_numbers = #tpu.dot_dimension_numbers<[1], [0], [0], [1], [0, 0, 1, 1], [], []>} : vector<8x32xf32>, vector<32x128xf32>, vector<8x128xf32> -> vector<8x128xf32>
    %88 = arith.addf %86, %87 : vector<8x128xf32>
    %89 = vector.extract_strided_slice %88 {offsets = [0, 0], sizes = [8, 96], strides = [1, 1]} : vector<8x128xf32> to vector<8x96xf32>
    %90 = arith.negf %89 : vector<8x96xf32>
    %91 = math.exp %90 : vector<8x96xf32>
    %cst_19 = arith.constant 1.000000e+00 : f32
    %92 = vector.broadcast %cst_19 : f32 to vector<8x96xf32>
    %93 = arith.addf %92, %91 : vector<8x96xf32>
    %94 = arith.divf %92, %93 : vector<8x96xf32>
    %95 = vector.extract_strided_slice %88 {offsets = [0, 96], sizes = [8, 32], strides = [1, 1]} : vector<8x128xf32> to vector<8x32xf32>
    %96 = math.tanh %95 : vector<8x32xf32>
    %97 = vector.extract_strided_slice %94 {offsets = [0, 0], sizes = [8, 32], strides = [1, 1]} : vector<8x96xf32> to vector<8x32xf32>
    %98 = vector.extract_strided_slice %94 {offsets = [0, 32], sizes = [8, 32], strides = [1, 1]} : vector<8x96xf32> to vector<8x32xf32>
    %99 = vector.extract_strided_slice %94 {offsets = [0, 64], sizes = [8, 32], strides = [1, 1]} : vector<8x96xf32> to vector<8x32xf32>
    %100 = arith.mulf %98, %83 : vector<8x32xf32>
    %101 = arith.mulf %97, %96 : vector<8x32xf32>
    %102 = arith.addf %100, %101 : vector<8x32xf32>
    %103 = math.tanh %102 : vector<8x32xf32>
    %104 = arith.mulf %99, %103 : vector<8x32xf32>
    %105 = vector.extract_strided_slice %6 {offsets = [40, 0], sizes = [8, 128], strides = [1, 1]} : vector<64x128xf32> to vector<8x128xf32>
    %cst_20 = arith.constant dense<0.000000e+00> : vector<8x128xf32>
    %106 = tpu.matmul %104, %7, %cst_20 {dimension_numbers = #tpu.dot_dimension_numbers<[1], [0], [0], [1], [0, 0, 1, 1], [], []>} : vector<8x32xf32>, vector<32x128xf32>, vector<8x128xf32> -> vector<8x128xf32>
    %107 = arith.addf %105, %106 : vector<8x128xf32>
    %108 = vector.extract_strided_slice %107 {offsets = [0, 0], sizes = [8, 96], strides = [1, 1]} : vector<8x128xf32> to vector<8x96xf32>
    %109 = arith.negf %108 : vector<8x96xf32>
    %110 = math.exp %109 : vector<8x96xf32>
    %cst_21 = arith.constant 1.000000e+00 : f32
    %111 = vector.broadcast %cst_21 : f32 to vector<8x96xf32>
    %112 = arith.addf %111, %110 : vector<8x96xf32>
    %113 = arith.divf %111, %112 : vector<8x96xf32>
    %114 = vector.extract_strided_slice %107 {offsets = [0, 96], sizes = [8, 32], strides = [1, 1]} : vector<8x128xf32> to vector<8x32xf32>
    %115 = math.tanh %114 : vector<8x32xf32>
    %116 = vector.extract_strided_slice %113 {offsets = [0, 0], sizes = [8, 32], strides = [1, 1]} : vector<8x96xf32> to vector<8x32xf32>
    %117 = vector.extract_strided_slice %113 {offsets = [0, 32], sizes = [8, 32], strides = [1, 1]} : vector<8x96xf32> to vector<8x32xf32>
    %118 = vector.extract_strided_slice %113 {offsets = [0, 64], sizes = [8, 32], strides = [1, 1]} : vector<8x96xf32> to vector<8x32xf32>
    %119 = arith.mulf %117, %102 : vector<8x32xf32>
    %120 = arith.mulf %116, %115 : vector<8x32xf32>
    %121 = arith.addf %119, %120 : vector<8x32xf32>
    %122 = math.tanh %121 : vector<8x32xf32>
    %123 = arith.mulf %118, %122 : vector<8x32xf32>
    %124 = vector.extract_strided_slice %6 {offsets = [48, 0], sizes = [8, 128], strides = [1, 1]} : vector<64x128xf32> to vector<8x128xf32>
    %cst_22 = arith.constant dense<0.000000e+00> : vector<8x128xf32>
    %125 = tpu.matmul %123, %7, %cst_22 {dimension_numbers = #tpu.dot_dimension_numbers<[1], [0], [0], [1], [0, 0, 1, 1], [], []>} : vector<8x32xf32>, vector<32x128xf32>, vector<8x128xf32> -> vector<8x128xf32>
    %126 = arith.addf %124, %125 : vector<8x128xf32>
    %127 = vector.extract_strided_slice %126 {offsets = [0, 0], sizes = [8, 96], strides = [1, 1]} : vector<8x128xf32> to vector<8x96xf32>
    %128 = arith.negf %127 : vector<8x96xf32>
    %129 = math.exp %128 : vector<8x96xf32>
    %cst_23 = arith.constant 1.000000e+00 : f32
    %130 = vector.broadcast %cst_23 : f32 to vector<8x96xf32>
    %131 = arith.addf %130, %129 : vector<8x96xf32>
    %132 = arith.divf %130, %131 : vector<8x96xf32>
    %133 = vector.extract_strided_slice %126 {offsets = [0, 96], sizes = [8, 32], strides = [1, 1]} : vector<8x128xf32> to vector<8x32xf32>
    %134 = math.tanh %133 : vector<8x32xf32>
    %135 = vector.extract_strided_slice %132 {offsets = [0, 0], sizes = [8, 32], strides = [1, 1]} : vector<8x96xf32> to vector<8x32xf32>
    %136 = vector.extract_strided_slice %132 {offsets = [0, 32], sizes = [8, 32], strides = [1, 1]} : vector<8x96xf32> to vector<8x32xf32>
    %137 = vector.extract_strided_slice %132 {offsets = [0, 64], sizes = [8, 32], strides = [1, 1]} : vector<8x96xf32> to vector<8x32xf32>
    %138 = arith.mulf %136, %121 : vector<8x32xf32>
    %139 = arith.mulf %135, %134 : vector<8x32xf32>
    %140 = arith.addf %138, %139 : vector<8x32xf32>
    %141 = math.tanh %140 : vector<8x32xf32>
    %142 = arith.mulf %137, %141 : vector<8x32xf32>
    %143 = vector.extract_strided_slice %6 {offsets = [56, 0], sizes = [8, 128], strides = [1, 1]} : vector<64x128xf32> to vector<8x128xf32>
    %cst_24 = arith.constant dense<0.000000e+00> : vector<8x128xf32>
    %144 = tpu.matmul %142, %7, %cst_24 {dimension_numbers = #tpu.dot_dimension_numbers<[1], [0], [0], [1], [0, 0, 1, 1], [], []>} : vector<8x32xf32>, vector<32x128xf32>, vector<8x128xf32> -> vector<8x128xf32>
    %145 = arith.addf %143, %144 : vector<8x128xf32>
    %146 = vector.extract_strided_slice %145 {offsets = [0, 0], sizes = [8, 96], strides = [1, 1]} : vector<8x128xf32> to vector<8x96xf32>
    %147 = arith.negf %146 : vector<8x96xf32>
    %148 = math.exp %147 : vector<8x96xf32>
    %cst_25 = arith.constant 1.000000e+00 : f32
    %149 = vector.broadcast %cst_25 : f32 to vector<8x96xf32>
    %150 = arith.addf %149, %148 : vector<8x96xf32>
    %151 = arith.divf %149, %150 : vector<8x96xf32>
    %152 = vector.extract_strided_slice %145 {offsets = [0, 96], sizes = [8, 32], strides = [1, 1]} : vector<8x128xf32> to vector<8x32xf32>
    %153 = math.tanh %152 : vector<8x32xf32>
    %154 = vector.extract_strided_slice %151 {offsets = [0, 0], sizes = [8, 32], strides = [1, 1]} : vector<8x96xf32> to vector<8x32xf32>
    %155 = vector.extract_strided_slice %151 {offsets = [0, 32], sizes = [8, 32], strides = [1, 1]} : vector<8x96xf32> to vector<8x32xf32>
    %156 = vector.extract_strided_slice %151 {offsets = [0, 64], sizes = [8, 32], strides = [1, 1]} : vector<8x96xf32> to vector<8x32xf32>
    %157 = arith.mulf %155, %140 : vector<8x32xf32>
    %158 = arith.mulf %154, %153 : vector<8x32xf32>
    %159 = arith.addf %157, %158 : vector<8x32xf32>
    %160 = math.tanh %159 : vector<8x32xf32>
    %161 = arith.mulf %156, %160 : vector<8x32xf32>
    %c0_26 = arith.constant 0 : index
    %c56 = arith.constant 56 : index
    %c0_27 = arith.constant 0 : index
    %162 = vector.load %arg1[%c0_26, %c56, %c0_27] : memref<1x64x16xf32, #tpu.memory_space<vmem>>, vector<1x8x16xf32>
    %163 = vector.shape_cast %162 : vector<1x8x16xf32> to vector<8x16xf32>
    %c0_28 = arith.constant 0 : index
    %c0_29 = arith.constant 0 : index
    %164 = vector.load %arg5[%c0_28, %c0_29] : memref<16x128xf32, #tpu.memory_space<vmem>>, vector<16x128xf32>
    %cst_30 = arith.constant dense<0.000000e+00> : vector<8x128xf32>
    %165 = tpu.matmul %163, %164, %cst_30 {dimension_numbers = #tpu.dot_dimension_numbers<[1], [0], [0], [1], [0, 0, 1, 1], [], []>} : vector<8x16xf32>, vector<16x128xf32>, vector<8x128xf32> -> vector<8x128xf32>
    %c0_31 = arith.constant 0 : index
    %c0_32 = arith.constant 0 : index
    %166 = vector.load %arg6[%c0_31, %c0_32] : memref<1x128xf32, #tpu.memory_space<vmem>>, vector<1x128xf32>
    %167 = vector.broadcast %166 : vector<1x128xf32> to vector<8x128xf32>
    %168 = arith.addf %165, %167 : vector<8x128xf32>
    %169 = vector.extract_strided_slice %168 {offsets = [0, 0], sizes = [8, 96], strides = [1, 1]} : vector<8x128xf32> to vector<8x96xf32>
    %170 = arith.negf %169 : vector<8x96xf32>
    %171 = math.exp %170 : vector<8x96xf32>
    %cst_33 = arith.constant 1.000000e+00 : f32
    %172 = vector.broadcast %cst_33 : f32 to vector<8x96xf32>
    %173 = arith.addf %172, %171 : vector<8x96xf32>
    %174 = arith.divf %172, %173 : vector<8x96xf32>
    %175 = vector.extract_strided_slice %168 {offsets = [0, 96], sizes = [8, 32], strides = [1, 1]} : vector<8x128xf32> to vector<8x32xf32>
    %176 = math.tanh %175 : vector<8x32xf32>
    %177 = vector.extract_strided_slice %174 {offsets = [0, 0], sizes = [8, 32], strides = [1, 1]} : vector<8x96xf32> to vector<8x32xf32>
    %178 = vector.extract_strided_slice %174 {offsets = [0, 64], sizes = [8, 32], strides = [1, 1]} : vector<8x96xf32> to vector<8x32xf32>
    %179 = arith.mulf %177, %176 : vector<8x32xf32>
    %180 = math.tanh %179 : vector<8x32xf32>
    %181 = arith.mulf %178, %180 : vector<8x32xf32>
    %c0_34 = arith.constant 0 : index
    %c0_35 = arith.constant 0 : index
    %c0_36 = arith.constant 0 : index
    %182 = vector.load %arg7[%c0_34, %c0_35, %c0_36] : memref<2x32x32xf32, #tpu.memory_space<vmem>>, vector<1x32x32xf32>
    %183 = vector.shape_cast %182 : vector<1x32x32xf32> to vector<32x32xf32>
    %cst_37 = arith.constant dense<0.000000e+00> : vector<8x32xf32>
    %184 = tpu.matmul %161, %183, %cst_37 {dimension_numbers = #tpu.dot_dimension_numbers<[1], [0], [0], [1], [0, 0, 1, 1], [], []>} : vector<8x32xf32>, vector<32x32xf32>, vector<8x32xf32> -> vector<8x32xf32>
    %c1 = arith.constant 1 : index
    %c0_38 = arith.constant 0 : index
    %c0_39 = arith.constant 0 : index
    %185 = vector.load %arg7[%c1, %c0_38, %c0_39] : memref<2x32x32xf32, #tpu.memory_space<vmem>>, vector<1x32x32xf32>
    %186 = vector.shape_cast %185 : vector<1x32x32xf32> to vector<32x32xf32>
    %cst_40 = arith.constant dense<0.000000e+00> : vector<8x32xf32>
    %187 = tpu.matmul %181, %186, %cst_40 {dimension_numbers = #tpu.dot_dimension_numbers<[1], [0], [0], [1], [0, 0, 1, 1], [], []>} : vector<8x32xf32>, vector<32x32xf32>, vector<8x32xf32> -> vector<8x32xf32>
    %188 = arith.addf %184, %187 : vector<8x32xf32>
    %c0_41 = arith.constant 0 : index
    %c0_42 = arith.constant 0 : index
    %189 = vector.load %arg8[%c0_41, %c0_42] : memref<1x32xf32, #tpu.memory_space<vmem>>, vector<1x32xf32>
    %190 = vector.broadcast %189 : vector<1x32xf32> to vector<8x32xf32>
    %191 = arith.addf %188, %190 : vector<8x32xf32>
    %cst_43 = arith.constant 0.000000e+00 : f32
    %192 = vector.broadcast %cst_43 : f32 to vector<8x32xf32>
    %193 = arith.maximumf %191, %192 : vector<8x32xf32>
    %c0_44 = arith.constant 0 : index
    %c0_45 = arith.constant 0 : index
    %194 = vector.load %arg9[%c0_44, %c0_45] : memref<32x128xf32, #tpu.memory_space<vmem>>, vector<32x128xf32>
    %cst_46 = arith.constant dense<0.000000e+00> : vector<8x128xf32>
    %195 = tpu.matmul %193, %194, %cst_46 {dimension_numbers = #tpu.dot_dimension_numbers<[1], [0], [0], [1], [0, 0, 1, 1], [], []>} : vector<8x32xf32>, vector<32x128xf32>, vector<8x128xf32> -> vector<8x128xf32>
    %c0_47 = arith.constant 0 : index
    %c0_48 = arith.constant 0 : index
    %196 = vector.load %arg10[%c0_47, %c0_48] : memref<1x128xf32, #tpu.memory_space<vmem>>, vector<1x128xf32>
    %197 = vector.broadcast %196 : vector<1x128xf32> to vector<8x128xf32>
    %198 = arith.addf %195, %197 : vector<8x128xf32>
    %199 = arith.negf %198 : vector<8x128xf32>
    %200 = math.exp %199 : vector<8x128xf32>
    %cst_49 = arith.constant 1.000000e+00 : f32
    %201 = vector.broadcast %cst_49 : f32 to vector<8x128xf32>
    %202 = arith.addf %201, %200 : vector<8x128xf32>
    %203 = arith.divf %201, %202 : vector<8x128xf32>
    %c0_50 = arith.constant 0 : index
    %c0_51 = arith.constant 0 : index
    %204 = vector.load %arg11[%c0_50, %c0_51] : memref<8x128xf32, #tpu.memory_space<vmem>>, vector<8x128xf32>
    tpu.vector_store %arg11[%c0_50, %c0_51], %203 {strides = array<i32>} : memref<8x128xf32, #tpu.memory_space<vmem>>, vector<8x128xf32>,
    return
  }
  func.func @transform_0(%arg0: i32) -> (i32, i32, i32) {
    %c0_i32 = arith.constant 0 : i32
    %c0_i32_0 = arith.constant 0 : i32
    %c0_i32_1 = arith.constant 0 : i32
    return %arg0, %c0_i32, %c0_i32_0 : i32, i32, i32
  }
  func.func @transform_1(%arg0: i32) -> (i32, i32) {
    %c0_i32 = arith.constant 0 : i32
    %c0_i32_0 = arith.constant 0 : i32
    %c0_i32_1 = arith.constant 0 : i32
    return %c0_i32, %c0_i32_0 : i32, i32
  }
  func.func @transform_2(%arg0: i32) -> (i32, i32) {
    %c0_i32 = arith.constant 0 : i32
    %c0_i32_0 = arith.constant 0 : i32
    %c0_i32_1 = arith.constant 0 : i32
    return %c0_i32, %c0_i32_0 : i32, i32
  }
  func.func @transform_3(%arg0: i32) -> (i32, i32) {
    %c0_i32 = arith.constant 0 : i32
    %c0_i32_0 = arith.constant 0 : i32
    %c0_i32_1 = arith.constant 0 : i32
    return %c0_i32, %c0_i32_0 : i32, i32
  }
  func.func @transform_4(%arg0: i32) -> (i32, i32) {
    %c0_i32 = arith.constant 0 : i32
    %c0_i32_0 = arith.constant 0 : i32
    %c0_i32_1 = arith.constant 0 : i32
    return %c0_i32, %c0_i32_0 : i32, i32
  }
  func.func @transform_5(%arg0: i32) -> (i32, i32) {
    %c0_i32 = arith.constant 0 : i32
    %c0_i32_0 = arith.constant 0 : i32
    %c0_i32_1 = arith.constant 0 : i32
    return %c0_i32, %c0_i32_0 : i32, i32
  }
  func.func @transform_6(%arg0: i32) -> (i32, i32, i32) {
    %c0_i32 = arith.constant 0 : i32
    %c0_i32_0 = arith.constant 0 : i32
    %c0_i32_1 = arith.constant 0 : i32
    %c0_i32_2 = arith.constant 0 : i32
    return %c0_i32, %c0_i32_0, %c0_i32_1 : i32, i32, i32
  }
  func.func @transform_7(%arg0: i32) -> (i32, i32) {
    %c0_i32 = arith.constant 0 : i32
    %c0_i32_0 = arith.constant 0 : i32
    %c0_i32_1 = arith.constant 0 : i32
    return %c0_i32, %c0_i32_0 : i32, i32
  }
  func.func @transform_8(%arg0: i32) -> (i32, i32) {
    %c0_i32 = arith.constant 0 : i32
    %c0_i32_0 = arith.constant 0 : i32
    %c0_i32_1 = arith.constant 0 : i32
    return %c0_i32, %c0_i32_0 : i32, i32
  }
  func.func @transform_9(%arg0: i32) -> (i32, i32) {
    %c0_i32 = arith.constant 0 : i32
    %c0_i32_0 = arith.constant 0 : i32
    %c0_i32_1 = arith.constant 0 : i32
    return %c0_i32, %c0_i32_0 : i32, i32
  }
  func.func @transform_10(%arg0: i32) -> (i32, i32) {
    %c0_i32 = arith.constant 0 : i32
    %c0_i32_0 = arith.constant 0 : i32
    return %arg0, %c0_i32 : i32, i32
  }
}

</mosaic_0001>

<bundles_post_ra>
// kernel: tpu_custom_call.1
= control target key start
LH: loop header
LB: loop body
LE: loop exit
PB: predicated region body
PF: predicated region fallthrough
CT: control target
= control target key end

     0   :  { %15 = vsyncpa [#allocation3], 0  ;;  %s2254_s0 = inlined_call_operand.vmem [shape: f32[1,64,16], index: 0, kind: input, shape index: {}]   ;;  %s2255_s1 = inlined_call_operand.hbm [shape: f32[16,128], index: 1, kind: input, shape index: {}]   ;;  %s2256_s2 = inlined_call_operand.vmem [shape: f32[1,128], index: 2, kind: input, shape index: {}]   ;;  %s2257_s3 = inlined_call_operand.vmem [shape: f32[32,128], index: 3, kind: input, shape index: {}]   ;;  %s2258_s4 = inlined_call_operand.hbm [shape: f32[16,128], index: 4, kind: input, shape index: {}]   ;;  %s2259_s5 = inlined_call_operand.vmem [shape: f32[1,128], index: 5, kind: input, shape index: {}]   ;;  %s2260_s6 = inlined_call_operand.vmem [shape: f32[2,32,32], index: 6, kind: input, shape index: {}]   ;;  %s2261_s7 = inlined_call_operand.vmem [shape: f32[1,32], index: 7, kind: input, shape index: {}]   ;;  %s2262_s8 = inlined_call_operand.hbm [shape: f32[32,128], index: 8, kind: input, shape index: {}]   ;;  %s2263_s9 = inlined_call_operand.vmem [shape: f32[1,128], index: 9, kind: input, shape index: {}]   ;;  %s2264_s10 = inlined_call_operand.hbm [shape: f32[8,128], index: 10, kind: output, shape index: {}]  }
   0x1   :  { %16 = vsyncpa [#allocation6], 0 }
   0x2   :  { %17 = vsyncpa [#allocation4], 0  ;;  %s1904_s13 = smov [#allocation5]   ;;  %s1905_s15 = smov [#allocation2]  }
   0x3   :  { %s41_s14 = sshll.u32 %s1904_s13, 4  ;;  %s25_s16 = sshll.u32 %s1905_s15, 4  ;;  %s42_s14 = int_to_ptr.vmem [resolvable:$true] %s41_s14  ;;  %s1970_s16 = int_to_ptr.vmem [resolvable:$true] %s25_s16 }
   0x4   :  { %s1810_s19 = scalar_lea.hbm %s2258_s4, 256 }
   0x5   :  { %p1811_p0 = scmp.ne.s32.totalorder %s2258_s4, %s1810_s19  ;;  %p1814_p1 = scmp.lt.u32.totalorder %s1810_s19, %s2258_s4 }
   0x7   :  { %p1816_p2 = pnand %p1814_p1, %p1811_p0 }
   0x9   :  { %1819 = shalt.err (!%p1816_p2)
}
   0xa   :  { %s1820_s24 = scalar_lea.vmem %s42_s14, 256  ;;  %p1825_p4 = scmp.lt.s32.totalorder %s42_s14, %s42_s14 }
   0xb   :  { %p1821_p3 = scmp.ne.s32.totalorder %s42_s14, %s1820_s24  ;;  %p1826_p5 = scmp.lt.s32.totalorder %s1820_s24, %s1820_s24 }
   0xd   :  { %p1827_p6 = por %p1826_p5, %p1825_p4 }
   0xf   :  { %p1828_p7 = pnand %p1827_p6, %p1821_p3 }
  0x11   :  { %1831 = shalt.err (!%p1828_p7)
}
  0x12   :  { %s1906_s25 = smov 128   ;;  %s1907_s26 = smov 8  }
  0x13   :  { %47 = dma.hbm_to_vmem [thread:$0]  %s2258_s4, 256, %s42_s14, [#allocation6], %s1906_s25, %s1906_s25, %s1907_s26  }
  0x14   :  { %s1832_s11 = scalar_lea.hbm %s2255_s1, 256 }
  0x15   :  { %p1833_p8 = scmp.ne.s32.totalorder %s2255_s1, %s1832_s11  ;;  %p1836_p9 = scmp.lt.u32.totalorder %s1832_s11, %s2255_s1 }
  0x17   :  { %p1838_p10 = pnand %p1836_p9, %p1833_p8 }
  0x19   :  { %1841 = shalt.err (!%p1838_p10)
}
  0x1a   :  { %s1842_s18 = scalar_lea.vmem %s1970_s16, 256  ;;  %p1847_p12 = scmp.lt.s32.totalorder %s1970_s16, %s1970_s16 }
  0x1b   :  { %p1843_p11 = scmp.ne.s32.totalorder %s1970_s16, %s1842_s18  ;;  %p1848_p13 = scmp.lt.s32.totalorder %s1842_s18, %s1842_s18 }
  0x1d   :  { %p1849_p0 = por %p1848_p13, %p1847_p12 }
  0x1f   :  { %p1850_p1 = pnand %p1849_p0, %p1843_p11 }
  0x21   :  { %1853 = shalt.err (!%p1850_p1)
}
  0x22   :  { %31 = dma.hbm_to_vmem [thread:$0]  %s2255_s1, 256, %s1970_s16, [#allocation3], %s1906_s25, %s1906_s25, %s1907_s26  }
  0x23   :  { %s1908_s19 = smov [#allocation7]   ;;  %s1854_s23 = scalar_lea.hbm %s2262_s8, 512 }
  0x24   :  { %s59_s20 = sshll.u32 %s1908_s19, 4  ;;  %p1855_p2 = scmp.ne.s32.totalorder %s2262_s8, %s1854_s23  ;;  %s60_s20 = int_to_ptr.vmem [resolvable:$true] %s59_s20 }
  0x25   :  { %p1858_p3 = scmp.lt.u32.totalorder %s1854_s23, %s2262_s8 }
  0x27   :  { %p1860_p4 = pnand %p1858_p3, %p1855_p2 }
  0x29   :  { %1863 = shalt.err (!%p1860_p4)
}
  0x2a   :  { %s1864_s30 = scalar_lea.vmem %s60_s20, 512  ;;  %p1869_p6 = scmp.lt.s32.totalorder %s60_s20, %s60_s20 }
  0x2b   :  { %p1865_p5 = scmp.ne.s32.totalorder %s60_s20, %s1864_s30  ;;  %p1870_p7 = scmp.lt.s32.totalorder %s1864_s30, %s1864_s30 }
  0x2d   :  { %p1871_p8 = por %p1870_p7, %p1869_p6 }
  0x2f   :  { %p1872_p9 = pnand %p1871_p8, %p1865_p5 }
  0x31   :  { %1875 = shalt.err (!%p1872_p9)
}
  0x32   :  { %65 = dma.hbm_to_vmem [thread:$0]  %s2262_s8, 512, %s60_s20, [#allocation6], %s1906_s25, %s1906_s25, %s1907_s26  }
  0x33   :  { %1898 = dma.done.wait [#allocation3], 256  }
  0x34   :  { %1899 = vsyncadd [#allocation3], 4294967040 }
  0x35   :  { %1900 = dma.done.wait [#allocation6], 768  }
  0x36   :  { %1901 = vsyncadd [#allocation6], 4294966528  ;;  %vm94_vm0 = vcmask 130048   ;;  %v85_v0 = vld [vmem:[#allocation2] sm:$0xff]  ;;  %v86_v1 = vld [vmem:[#allocation2 + $0x8] sm:$0xff]  ;;  %v1909_v10 = vmov 0.0|0.0  }
  0x37   :  { %v81_v2 = vld [vmem:[%s2254_s0 + $0x20] sm:$0xff]  ;;  %v1648_v3 = vpack.c.bf16 %v86_v1, %v85_v0  ;;  %v225_v5 = vld [vmem:[%s2257_s3 + $0x8] sm:$0xff]  ;;  %v83_v11 = vld [vmem:[%s2254_s0 + $0x30] sm:$0xff]  ;;  %vm1910_vm1 = vmmov 0   ;;  %v1911_v16 = vmov 0.0   ;;  %s1912_s1 = smov 32  }
  0x38   :  { %1514 = vmatprep.mubr.msk.f32.mxu1 %vm94_vm0, %v81_v2  ;;  %v224_v4 = vld [vmem:[%s2257_s3] sm:$0xff]  ;;  %v82_v7 = vld [vmem:[%s2254_s0 + $0x28] sm:$0xff]  ;;  %v226_v12 = vld [vmem:[%s2257_s3 + $0x10] sm:$0xff]  ;;  %vm228_vm2 = vcmask 261120  }
  0x39   :  { %v77_v6 = vld [vmem:[%s2254_s0] sm:$0xff]  ;;  %1721 = vmatprep.subr.bf16.mxu1 %v1648_v3  ;;  %1649 = vmatprep.subr.bf16.mxu0 %v1648_v3  ;;  %v2038_v8 = vpack.c.bf16 %v225_v5, %v224_v4  ;;  %v78_v9 = vld [vmem:[%s2254_s0 + $0x8] sm:$0xff]  ;;  %v227_v13 = vld [vmem:[%s2257_s3 + $0x18] sm:$0xff] }
  0x3a   :  { %1722 = vmatpush3.bf16.msra.mxu1 %v1648_v3  ;;  %1651 = vmatpush3.bf16.msra.mxu0 %v1648_v3  ;;  %v2062_v14 = vld [vmem:[%s2254_s0 + $0x38] sm:$0xff]  ;;  %v2064_v15 = vpack.c.bf16 %v227_v13, %v226_v12  ;;  %v2091_v21 = vld [vmem:[%s2256_s2] ss:$0 sm:$0xff]  ;;  %s1913_s2 = smov 64   ;;  %v79_v56 = vld [vmem:[%s2254_s0 + $0x10] sm:$0xff] }
  0x3b   :  { %1652 = vmatprep.subr.bf16.mxu1 %v1909_v10  ;;  %1508 = vmatprep.mubr.msk.f32.mxu0 %vm94_vm0, %v77_v6  ;;  %v80_v57 = vld [vmem:[%s2254_s0 + $0x18] sm:$0xff] }
  0x3c   :  { %1664 = vmatprep.subr.bf16.mxu0 %v1909_v10 }
  0x3d   :  { %1515 = vmatmul.mubr.msk.f32.vlgmr.msra.gmra.mrb[0].mxu1 %vm94_vm0, %v82_v7  ;;  %1509 = vmatmul.mubr.msk.f32.vlgmr.msra.gmra.mrb[0].mxu0 %vm94_vm0, %v78_v9 }
  0x3e   :  { %1654 = vmatpush3.bf16.msra.mxu1 %v2038_v8  ;;  %1517 = vmatprep.mubr.msk.f32.mxu1 %vm94_vm0, %v83_v11 }
  0x3f   :  { %1655 = vmatprep.subr.bf16.mxu1 %v1909_v10  ;;  %1666 = vmatpush3.bf16.msra.mxu0 %v2038_v8 }
  0x40   :  { %1667 = vmatprep.subr.bf16.mxu0 %v1909_v10  ;;  %1511 = vmatprep.mubr.msk.f32.mxu0 %vm94_vm0, %v79_v56 }
  0x41   :  { %1518 = vmatmul.mubr.msk.f32.gmra.mrb[2].mxu1 %vm94_vm0, %v2062_v14  ;;  %1512 = vmatmul.mubr.msk.f32.gmra.mrb[2].mxu0 %vm94_vm0, %v80_v57 }
  0x42   :  { %1657 = vmatpush3.bf16.msra.mxu1 %v2064_v15  ;;  %1528 = vmatprep.mubr.msk.f32.mxu1 %vm1910_vm1, %v1911_v16 }
  0x43   :  { %1658 = vmatprep.subr.bf16.mxu1 %v1909_v10  ;;  %1669 = vmatpush3.bf16.msra.mxu0 %v2064_v15 }
  0x44   :  { %1676 = vmatprep.subr.bf16.mxu0 %v1909_v10  ;;  %1550 = vmatprep.mubr.msk.f32.mxu0 %vm1910_vm1, %v1911_v16 }
  0x45   :  { %1529 = vmatmul.mubr.f32.vlgmr.msra.gmra.mrb[4].mxu1 %v1911_v16 }
  0x46   :  { %1660 = vmatpush3.bf16.msra.mxu1 %v2038_v8  ;;  %1539 = vmatprep.mubr.msk.f32.mxu1 %vm1910_vm1, %v1911_v16 }
  0x47   :  { %1661 = vmatprep.subr.bf16.mxu1 %v1909_v10 }
  0x4a   :  { %1663 = vmatpush3.bf16.msra.mxu1 %v2064_v15 }
  0x4b   :  { %1670 = vmatprep.subr.bf16.mxu1 %v1909_v10 }
 0x110   :  { %v2084_v17 = vpop.f32.mrb[0].mxu1  ;;  %v1510_v18 = vpop.f32.mrb[0].mxu0 }
 0x111   :  { %v2086_v19 = vpop.f32.mrb[1].mxu1  ;;  %v185_v20 = vpop.f32.mrb[1].mxu0  ;;  %v191_v42 = vadd.f32 %v1510_v18, %v2091_v21 }
 0x112   :  { %v186_v24 = vadd.f32 %v2091_v21, %v185_v20 }
 0x114   :  { %v2093_v22 = vpop.f32.mrb[2].mxu1  ;;  %v1513_v61 = vpop.f32.mrb[2].mxu0 }
 0x115   :  { %v2095_v23 = vpop.f32.mrb[3].mxu1  ;;  %v195_v62 = vpop.f32.mrb[3].mxu0 }
 0x116   :  { %v196_v0 = vadd.f32 %v2091_v21, %v195_v62 }
 0x118   :  { %v298_v25 = vpop.f32.mrb[4].mxu1 }
 0x119   :  { %v302_v26 = vadd.f32 %v298_v25, %v186_v24  ;;  %v1530_v27 = vpop.f32.mrb[5].mxu1 }
 0x11b   :  { %1734 = vtanh.f32 %v302_v26  ;;  %v1408_v29 = vmul.f32 -1.442695, %v302_v26 }
 0x11d   :  { %1736 = vpow2.f32 %v1408_v29 }
 0x125   :  { %v1735_v28 = vpop.eup %1734 }
 0x126   :  { %312 = vrot.lane.b32.xlu0 %v1735_v28, %s1912_s1  ;;  %v201_v28 = vadd.f32 %v1513_v61, %v2091_v21 }
 0x127   :  { %v1737_v30 = vpop.eup %1736 }
 0x128   :  { %v306_v31 = vadd.f32 1.0, %v1737_v30 }
 0x12a   :  { %1738 = vrcp.f32 %v306_v31 }
 0x134   :  { %v1739_v32 = vpop.eup %1738 }
 0x135   :  { %v310_v35 = vmul.f32 0.0, %v1739_v32 }
 0x198   :  { %v313_v33 = vpop.permute.xlu0 %312 }
 0x199   :  { %v315_v34 = vmul.f32 %v1739_v32, %v313_v33 }
 0x19b   :  { %317 = vrot.lane.b32.xlu0 %v315_v34, %s1912_s1 }
 0x20d   :  { %v318_v36 = vpop.permute.xlu0 %317 }
 0x20e   :  { %v320_v37 = vadd.f32 %v318_v36, %v310_v35 }
 0x210   :  { %1740 = vtanh.f32 %v320_v37 }
 0x21a   :  { %v1741_v38 = vpop.eup %1740 }
 0x21b   :  { %323 = vrot.lane.b32.xlu1 %v1741_v38, %s1912_s1 }
 0x28d   :  { %v324_v39 = vpop.permute.xlu1 %323 }
 0x28e   :  { %v326_v40 = vmul.f32 %v1739_v32, %v324_v39 }
 0x290   :  { %328 = vrot.lane.b32.xlu1 %v326_v40, %s1913_s2 }
 0x302   :  { %v329_v41 = vpop.permute.xlu1 %328 }
 0x303   :  { %1540 = vmatmul.mubr.msk.f32.vlgmr.msra.gmra.mrb[6].mxu1 %vm228_vm2, %v329_v41 }
 0x304   :  { %1672 = vmatpush3.bf16.msra.mxu1 %v2038_v8  ;;  %1561 = vmatprep.mubr.msk.f32.mxu1 %vm1910_vm1, %v1911_v16 }
 0x305   :  { %1673 = vmatprep.subr.bf16.mxu1 %v1909_v10 }
 0x308   :  { %1675 = vmatpush3.bf16.msra.mxu1 %v2064_v15 }
 0x309   :  { %1682 = vmatprep.subr.bf16.mxu1 %v1909_v10 }
 0x3d6   :  { %v398_v43 = vpop.f32.mrb[6].mxu1 }
 0x3d7   :  { %v402_v44 = vadd.f32 %v398_v43, %v191_v42  ;;  %v1541_v45 = vpop.f32.mrb[7].mxu1 }
 0x3d9   :  { %1742 = vtanh.f32 %v402_v44  ;;  %v1410_v47 = vmul.f32 -1.442695, %v402_v44 }
 0x3db   :  { %1744 = vpow2.f32 %v1410_v47 }
 0x3e3   :  { %v1743_v46 = vpop.eup %1742 }
 0x3e4   :  { %412 = vrot.lane.b32.xlu0 %v1743_v46, %s1912_s1  ;;  %v206_v46 = vadd.f32 %v2091_v21, %v2086_v19 }
 0x3e5   :  { %v1745_v48 = vpop.eup %1744 }
 0x3e6   :  { %v406_v49 = vadd.f32 1.0, %v1745_v48 }
 0x3e8   :  { %1746 = vrcp.f32 %v406_v49 }
 0x3f2   :  { %v1747_v50 = vpop.eup %1746 }
 0x3f3   :  { %v410_v53 = vmul.f32 %v1747_v50, %v320_v37 }
 0x456   :  { %v413_v51 = vpop.permute.xlu0 %412 }
 0x457   :  { %v415_v52 = vmul.f32 %v1747_v50, %v413_v51 }
 0x459   :  { %417 = vrot.lane.b32.xlu1 %v415_v52, %s1912_s1 }
 0x4cb   :  { %v418_v54 = vpop.permute.xlu1 %417 }
 0x4cc   :  { %v420_v55 = vadd.f32 %v418_v54, %v410_v53 }
 0x4ce   :  { %1748 = vtanh.f32 %v420_v55 }
 0x4d8   :  { %v1749_v58 = vpop.eup %1748 }
 0x4d9   :  { %423 = vrot.lane.b32.xlu0 %v1749_v58, %s1912_s1 }
 0x54b   :  { %v424_v59 = vpop.permute.xlu0 %423 }
 0x54c   :  { %v426_v60 = vmul.f32 %v1747_v50, %v424_v59 }
 0x54e   :  { %428 = vrot.lane.b32.xlu1 %v426_v60, %s1913_s2 }
 0x5c0   :  { %v429_v63 = vpop.permute.xlu1 %428 }
 0x5c1   :  { %1551 = vmatmul.mubr.msk.f32.vlgmr.msra.gmra.mrb[4].mxu0 %vm228_vm2, %v429_v63  ;;  %v211_v63 = vadd.f32 %v2084_v17, %v2091_v21 }
 0x5c2   :  { %1678 = vmatpush3.bf16.msra.mxu0 %v2038_v8  ;;  %1572 = vmatprep.mubr.msk.f32.mxu0 %vm1910_vm1, %v1911_v16 }
 0x5c3   :  { %1679 = vmatprep.subr.bf16.mxu0 %v1909_v10 }
 0x5c6   :  { %1681 = vmatpush3.bf16.msra.mxu0 %v2064_v15 }
 0x5c7   :  { %1688 = vmatprep.subr.bf16.mxu0 %v1909_v10 }
 0x694   :  { %v498_v1 = vpop.f32.mrb[4].mxu0 }
 0x695   :  { %v502_v2 = vadd.f32 %v498_v1, %v196_v0  ;;  %v1552_v3 = vpop.f32.mrb[5].mxu0 }
 0x697   :  { %1750 = vtanh.f32 %v502_v2  ;;  %v1412_v5 = vmul.f32 -1.442695, %v502_v2 }
 0x699   :  { %1752 = vpow2.f32 %v1412_v5 }
 0x6a1   :  { %v1751_v4 = vpop.eup %1750 }
 0x6a2   :  { %512 = vrot.lane.b32.xlu0 %v1751_v4, %s1912_s1 }
 0x6a3   :  { %v1753_v6 = vpop.eup %1752 }
 0x6a4   :  { %v506_v7 = vadd.f32 1.0, %v1753_v6 }
 0x6a6   :  { %1754 = vrcp.f32 %v506_v7 }
 0x6b0   :  { %v1755_v9 = vpop.eup %1754 }
 0x6b1   :  { %v510_v13 = vmul.f32 %v1755_v9, %v420_v55 }
 0x714   :  { %v513_v11 = vpop.permute.xlu0 %512 }
 0x715   :  { %v515_v12 = vmul.f32 %v1755_v9, %v513_v11 }
 0x717   :  { %517 = vrot.lane.b32.xlu1 %v515_v12, %s1912_s1 }
 0x789   :  { %v518_v18 = vpop.permute.xlu1 %517 }
 0x78a   :  { %v520_v20 = vadd.f32 %v518_v18, %v510_v13 }
 0x78c   :  { %1756 = vtanh.f32 %v520_v20 }
 0x796   :  { %v1757_v24 = vpop.eup %1756 }
 0x797   :  { %523 = vrot.lane.b32.xlu0 %v1757_v24, %s1912_s1  ;;  %v216_v24 = vadd.f32 %v2091_v21, %v2095_v23 }
 0x809   :  { %v524_v25 = vpop.permute.xlu0 %523 }
 0x80a   :  { %v526_v26 = vmul.f32 %v1755_v9, %v524_v25 }
 0x80c   :  { %528 = vrot.lane.b32.xlu1 %v526_v26, %s1913_s2 }
 0x87e   :  { %v529_v27 = vpop.permute.xlu1 %528 }
 0x87f   :  { %1562 = vmatmul.mubr.msk.f32.vlgmr.msra.gmra.mrb[8].mxu1 %vm228_vm2, %v529_v27 }
 0x880   :  { %1684 = vmatpush3.bf16.msra.mxu1 %v2038_v8  ;;  %1583 = vmatprep.mubr.msk.f32.mxu1 %vm1910_vm1, %v1911_v16 }
 0x881   :  { %1685 = vmatprep.subr.bf16.mxu1 %v1909_v10 }
 0x884   :  { %1687 = vmatpush3.bf16.msra.mxu1 %v2064_v15 }
 0x885   :  { %1694 = vmatprep.subr.bf16.mxu1 %v1909_v10 }
 0x952   :  { %v598_v29 = vpop.f32.mrb[8].mxu1 }
 0x953   :  { %v602_v30 = vadd.f32 %v598_v29, %v201_v28  ;;  %v1563_v31 = vpop.f32.mrb[9].mxu1 }
 0x955   :  { %1758 = vtanh.f32 %v602_v30  ;;  %v1414_v33 = vmul.f32 -1.442695, %v602_v30 }
 0x957   :  { %1760 = vpow2.f32 %v1414_v33 }
 0x95f   :  { %v1759_v32 = vpop.eup %1758 }
 0x960   :  { %612 = vrot.lane.b32.xlu0 %v1759_v32, %s1912_s1 }
 0x961   :  { %v1761_v34 = vpop.eup %1760 }
 0x962   :  { %v606_v35 = vadd.f32 1.0, %v1761_v34 }
 0x964   :  { %1762 = vrcp.f32 %v606_v35 }
 0x96e   :  { %v1763_v36 = vpop.eup %1762 }
 0x96f   :  { %v610_v39 = vmul.f32 %v1763_v36, %v520_v20 }
 0x9d2   :  { %v613_v37 = vpop.permute.xlu0 %612 }
 0x9d3   :  { %v615_v38 = vmul.f32 %v1763_v36, %v613_v37 }
 0x9d5   :  { %617 = vrot.lane.b32.xlu1 %v615_v38, %s1912_s1  ;;  %v1027_v38 = vld [vmem:[#allocation5] sm:$0xff] }
 0xa47   :  { %v618_v40 = vpop.permute.xlu1 %617 }
 0xa48   :  { %v620_v41 = vadd.f32 %v618_v40, %v610_v39  ;;  %v1028_v39 = vld [vmem:[#allocation5 + $0x8] sm:$0xff] }
 0xa49   :  { %v1701_v40 = vpack.c.bf16 %v1028_v39, %v1027_v38 }
 0xa4a   :  { %1764 = vtanh.f32 %v620_v41 }
 0xa54   :  { %v1765_v42 = vpop.eup %1764 }
 0xa55   :  { %623 = vrot.lane.b32.xlu0 %v1765_v42, %s1912_s1 }
 0xac7   :  { %v624_v43 = vpop.permute.xlu0 %623 }
 0xac8   :  { %v626_v44 = vmul.f32 %v1763_v36, %v624_v43 }
 0xaca   :  { %628 = vrot.lane.b32.xlu1 %v626_v44, %s1913_s2 }
 0xb3c   :  { %v629_v45 = vpop.permute.xlu1 %628 }
 0xb3d   :  { %1573 = vmatmul.mubr.msk.f32.vlgmr.msra.gmra.mrb[6].mxu0 %vm228_vm2, %v629_v45 }
 0xb3e   :  { %1690 = vmatpush3.bf16.msra.mxu0 %v2038_v8  ;;  %1594 = vmatprep.mubr.msk.f32.mxu0 %vm1910_vm1, %v1911_v16 }
 0xb3f   :  { %1691 = vmatprep.subr.bf16.mxu0 %v1909_v10 }
 0xb42   :  { %1693 = vmatpush3.bf16.msra.mxu0 %v2064_v15 }
 0xb43   :  { %1700 = vmatprep.subr.bf16.mxu0 %v1909_v10 }
 0xc10   :  { %v698_v47 = vpop.f32.mrb[6].mxu0 }
 0xc11   :  { %v702_v48 = vadd.f32 %v698_v47, %v206_v46  ;;  %v1574_v49 = vpop.f32.mrb[7].mxu0  ;;  %v1423_v46 = vld [vmem:[%s2259_s5] ss:$0 sm:$0xff] }
 0xc13   :  { %1766 = vtanh.f32 %v702_v48  ;;  %v1416_v51 = vmul.f32 -1.442695, %v702_v48 }
 0xc15   :  { %1768 = vpow2.f32 %v1416_v51 }
 0xc1d   :  { %v1767_v50 = vpop.eup %1766 }
 0xc1e   :  { %712 = vrot.lane.b32.xlu0 %v1767_v50, %s1912_s1 }
 0xc1f   :  { %v1769_v52 = vpop.eup %1768 }
 0xc20   :  { %v706_v53 = vadd.f32 1.0, %v1769_v52 }
 0xc22   :  { %1770 = vrcp.f32 %v706_v53 }
 0xc2c   :  { %v1771_v54 = vpop.eup %1770 }
 0xc2d   :  { %v710_v57 = vmul.f32 %v1771_v54, %v620_v41 }
 0xc90   :  { %v713_v55 = vpop.permute.xlu0 %712 }
 0xc91   :  { %v715_v56 = vmul.f32 %v1771_v54, %v713_v55 }
 0xc93   :  { %717 = vrot.lane.b32.xlu1 %v715_v56, %s1912_s1 }
 0xd05   :  { %v718_v58 = vpop.permute.xlu1 %717 }
 0xd06   :  { %v720_v19 = vadd.f32 %v718_v58, %v710_v57 }
 0xd08   :  { %1772 = vtanh.f32 %v720_v19 }
 0xd12   :  { %v1773_v59 = vpop.eup %1772 }
 0xd13   :  { %723 = vrot.lane.b32.xlu0 %v1773_v59, %s1912_s1 }
 0xd85   :  { %v724_v60 = vpop.permute.xlu0 %723 }
 0xd86   :  { %v726_v61 = vmul.f32 %v1771_v54, %v724_v60 }
 0xd88   :  { %728 = vrot.lane.b32.xlu1 %v726_v61, %s1913_s2 }
 0xdfa   :  { %v729_v62 = vpop.permute.xlu1 %728 }
 0xdfb   :  { %1584 = vmatmul.mubr.msk.f32.vlgmr.msra.gmra.mrb[10].mxu1 %vm228_vm2, %v729_v62  ;;  %v1426_v62 = vld [vmem:[%s2260_s6 + $0x20] sm:$0xff] }
 0xdfc   :  { %1696 = vmatpush3.bf16.msra.mxu1 %v2038_v8  ;;  %1605 = vmatprep.mubr.msk.f32.mxu1 %vm1910_vm1, %v1911_v16 }
 0xdfd   :  { %1697 = vmatprep.subr.bf16.mxu1 %v1909_v10 }
 0xe00   :  { %1699 = vmatpush3.bf16.msra.mxu1 %v2064_v15 }
 0xe01   :  { %1709 = vmatprep.subr.bf16.mxu1 %v1909_v10 }
 0xece   :  { %v798_v0 = vpop.f32.mrb[10].mxu1 }
 0xecf   :  { %v802_v1 = vadd.f32 %v798_v0, %v211_v63  ;;  %v1585_v2 = vpop.f32.mrb[11].mxu1  ;;  %v1427_v63 = vld [vmem:[%s2260_s6 + $0x28] sm:$0xff] }
 0xed0   :  { %v1704_v0 = vpack.c.bf16 %v1427_v63, %v1426_v62 }
 0xed1   :  { %1774 = vtanh.f32 %v802_v1  ;;  %v1418_v8 = vmul.f32 -1.442695, %v802_v1 }
 0xed3   :  { %1776 = vpow2.f32 %v1418_v8  ;;  %v1429_v8 = vld [vmem:[%s2260_s6 + $0x38] sm:$0xff] }
 0xedb   :  { %v1775_v3 = vpop.eup %1774 }
 0xedc   :  { %812 = vrot.lane.b32.xlu0 %v1775_v3, %s1912_s1  ;;  %v1428_v3 = vld [vmem:[%s2260_s6 + $0x30] sm:$0xff] }
 0xedd   :  { %v1777_v4 = vpop.eup %1776 }
 0xede   :  { %v806_v5 = vadd.f32 1.0, %v1777_v4 }
 0xee0   :  { %1778 = vrcp.f32 %v806_v5  ;;  %v1707_v5 = vpack.c.bf16 %v1429_v8, %v1428_v3 }
 0xeea   :  { %v1779_v6 = vpop.eup %1778 }
 0xeeb   :  { %v810_v9 = vmul.f32 %v1779_v6, %v720_v19 }
 0xf4e   :  { %v813_v7 = vpop.permute.xlu0 %812 }
 0xf4f   :  { %v815_v15 = vmul.f32 %v1779_v6, %v813_v7  ;;  %v1124_v7 = vld [vmem:[%s2260_s6] sm:$0xff] }
 0xf51   :  { %817 = vrot.lane.b32.xlu1 %v815_v15, %s1912_s1  ;;  %v1125_v15 = vld [vmem:[%s2260_s6 + $0x8] sm:$0xff] }
 0xfc3   :  { %v818_v11 = vpop.permute.xlu1 %817 }
 0xfc4   :  { %v820_v17 = vadd.f32 %v818_v11, %v810_v9  ;;  %v1126_v9 = vld [vmem:[%s2260_s6 + $0x10] sm:$0xff]  ;;  %v1710_v11 = vpack.c.bf16 %v1125_v15, %v1124_v7 }
 0xfc6   :  { %1780 = vtanh.f32 %v820_v17 }
 0xfd0   :  { %v1781_v12 = vpop.eup %1780 }
 0xfd1   :  { %823 = vrot.lane.b32.xlu0 %v1781_v12, %s1912_s1 }
0x1043   :  { %v824_v13 = vpop.permute.xlu0 %823 }
0x1044   :  { %v826_v18 = vmul.f32 %v1779_v6, %v824_v13 }
0x1046   :  { %828 = vrot.lane.b32.xlu1 %v826_v18, %s1913_s2 }
0x10b8   :  { %v829_v20 = vpop.permute.xlu1 %828 }
0x10b9   :  { %1595 = vmatmul.mubr.msk.f32.vlgmr.msra.gmra.mrb[8].mxu0 %vm228_vm2, %v829_v20 }
0x10ba   :  { %1612 = vmatprep.mubr.msk.f32.mxu0 %vm1910_vm1, %v1911_v16  ;;  %1702 = vmatpush3.bf16.msra.mxu0 %v1701_v40 }
0x10bb   :  { %1703 = vmatprep.subr.bf16.mxu0 %v1909_v10 }
0x10bd   :  { %1613 = vmatmul.mubr.msk.f32.vlgmr.msra.gmra.mrb[10].mxu0 %vm94_vm0, %v2062_v14  ;;  %v221_v14 = vadd.f32 %v2093_v22, %v2091_v21 }
0x10be   :  { %1623 = vmatprep.mubr.msk.f32.mxu0 %vm1910_vm1, %v1911_v16  ;;  %1705 = vmatpush3.bf16.msra.mxu0 %v1704_v0 }
0x10bf   :  { %1706 = vmatprep.subr.bf16.mxu0 %v1909_v10 }
0x10c2   :  { %1708 = vmatpush3.bf16.msra.mxu0 %v1707_v5 }
0x10c3   :  { %1715 = vmatprep.subr.bf16.mxu0 %v1909_v10 }
0x118c   :  { %v898_v25 = vpop.f32.mrb[8].mxu0 }
0x118d   :  { %v902_v26 = vadd.f32 %v898_v25, %v216_v24  ;;  %v1596_v27 = vpop.f32.mrb[9].mxu0 }
0x118f   :  { %1782 = vtanh.f32 %v902_v26  ;;  %v1420_v29 = vmul.f32 -1.442695, %v902_v26 }
0x1190   :  { %v1102_v44 = vpop.f32.mrb[10].mxu0 }
0x1191   :  { %1784 = vpow2.f32 %v1420_v29  ;;  %v1614_v45 = vpop.f32.mrb[11].mxu0  ;;  %v1103_v50 = vadd.f32 %v1423_v46, %v1102_v44  ;;  %v1293_v29 = vld [vmem:[#allocation7 + $0x8] sm:$0xff] }
0x1193   :  { %v1425_v54 = vmul.f32 -1.442695, %v1103_v50 }
0x1199   :  { %v1783_v28 = vpop.eup %1782 }
0x119a   :  { %912 = vrot.lane.b32.xlu0 %v1783_v28, %s1912_s1  ;;  %v1292_v28 = vld [vmem:[#allocation7] sm:$0xff] }
0x119b   :  { %v1785_v30 = vpop.eup %1784 }
0x119c   :  { %v906_v31 = vadd.f32 1.0, %v1785_v30  ;;  %v1716_v30 = vpack.c.bf16 %v1293_v29, %v1292_v28 }
0x119e   :  { %1786 = vrcp.f32 %v906_v31  ;;  %v1294_v31 = vld [vmem:[#allocation7 + $0x10] sm:$0xff] }
0x11a8   :  { %v1787_v32 = vpop.eup %1786 }
0x11a9   :  { %v910_v35 = vmul.f32 %v1787_v32, %v820_v17  ;;  %v1127_v17 = vld [vmem:[%s2260_s6 + $0x18] sm:$0xff] }
0x11aa   :  { %v1713_v12 = vpack.c.bf16 %v1127_v17, %v1126_v9 }
0x120c   :  { %v913_v33 = vpop.permute.xlu0 %912 }
0x120d   :  { %v915_v34 = vmul.f32 %v1787_v32, %v913_v33 }
0x120f   :  { %917 = vrot.lane.b32.xlu1 %v915_v34, %s1912_s1 }
0x1281   :  { %v918_v36 = vpop.permute.xlu1 %917 }
0x1282   :  { %v920_v23 = vadd.f32 %v918_v36, %v910_v35 }
0x1284   :  { %1788 = vtanh.f32 %v920_v23 }
0x128e   :  { %v1789_v37 = vpop.eup %1788 }
0x128f   :  { %923 = vrot.lane.b32.xlu0 %v1789_v37, %s1912_s1 }
0x1301   :  { %v924_v41 = vpop.permute.xlu0 %923 }
0x1302   :  { %v926_v42 = vmul.f32 %v1787_v32, %v924_v41  ;;  %v1295_v32 = vld [vmem:[#allocation7 + $0x18] sm:$0xff] }
0x1303   :  { %v1719_v33 = vpack.c.bf16 %v1295_v32, %v1294_v31 }
0x1304   :  { %928 = vrot.lane.b32.xlu1 %v926_v42, %s1913_s2 }
0x1376   :  { %v929_v43 = vpop.permute.xlu1 %928 }
0x1377   :  { %1606 = vmatmul.mubr.msk.f32.vlgmr.msra.gmra.mrb[12].mxu1 %vm228_vm2, %v929_v43 }
0x1378   :  { %1634 = vmatprep.mubr.msk.f32.mxu1 %vm1910_vm1, %v1911_v16  ;;  %1711 = vmatpush3.bf16.msra.mxu1 %v1710_v11 }
0x1379   :  { %1712 = vmatprep.subr.bf16.mxu1 %v1909_v10 }
0x137c   :  { %1714 = vmatpush3.bf16.msra.mxu1 %v1713_v12 }
0x144a   :  { %v998_v47 = vpop.f32.mrb[12].mxu1 }
0x144b   :  { %v1002_v48 = vadd.f32 %v998_v47, %v221_v14  ;;  %v1607_v49 = vpop.f32.mrb[13].mxu1 }
0x144d   :  { %1790 = vtanh.f32 %v1002_v48  ;;  %v1422_v53 = vmul.f32 -1.442695, %v1002_v48 }
0x144e   :  { %1792 = vtanh.f32 %v1103_v50 }
0x144f   :  { %1794 = vpow2.f32 %v1422_v53 }
0x1450   :  { %1796 = vpow2.f32 %v1425_v54 }
0x1457   :  { %v1791_v51 = vpop.eup %1790 }
0x1458   :  { %1012 = vrot.lane.b32.xlu0 %v1791_v51, %s1912_s1  ;;  %v1793_v52 = vpop.eup %1792 }
0x1459   :  { %v1795_v55 = vpop.eup %1794 }
0x145a   :  { %v1797_v56 = vpop.eup %1796  ;;  %v1006_v57 = vadd.f32 1.0, %v1795_v55 }
0x145b   :  { %v1109_v21 = vadd.f32 1.0, %v1797_v56 }
0x145c   :  { %1114 = vrot.lane.b32.xlu0 %v1793_v52, %s1912_s1  ;;  %1798 = vrcp.f32 %v1006_v57 }
0x145d   :  { %1800 = vrcp.f32 %v1109_v21 }
0x1466   :  { %v1799_v22 = vpop.eup %1798 }
0x1467   :  { %v1801_v59 = vpop.eup %1800  ;;  %v1010_v2 = vmul.f32 %v1799_v22, %v920_v23 }
0x14ca   :  { %v1013_v58 = vpop.permute.xlu0 %1012 }
0x14cb   :  { %v1015_v19 = vmul.f32 %v1799_v22, %v1013_v58 }
0x14cd   :  { %1017 = vrot.lane.b32.xlu1 %v1015_v19, %s1912_s1 }
0x14ce   :  { %v1115_v60 = vpop.permute.xlu0 %1114 }
0x14cf   :  { %v1117_v61 = vmul.f32 %v1801_v59, %v1115_v60 }
0x14d1   :  { %1802 = vtanh.f32 %v1117_v61 }
0x14db   :  { %v1803_v1 = vpop.eup %1802 }
0x14dc   :  { %1120 = vrot.lane.b32.xlu0 %v1803_v1, %s1913_s2 }
0x153f   :  { %v1018_v4 = vpop.permute.xlu1 %1017 }
0x1540   :  { %v1020_v6 = vadd.f32 %v1018_v4, %v1010_v2 }
0x1542   :  { %1804 = vtanh.f32 %v1020_v6 }
0x154c   :  { %v1805_v13 = vpop.eup %1804 }
0x154d   :  { %1023 = vrot.lane.b32.xlu1 %v1805_v13, %s1912_s1  ;;  %s1914_s1 = smov [#allocation8]  }
0x154e   :  { %v1121_v18 = vpop.permute.xlu0 %1120 }
0x154f   :  { %v1123_v20 = vmul.f32 %v1801_v59, %v1121_v18 }
0x1551   :  { %1134 = vrot.lane.b32.xlu1 %v1123_v20, %s1913_s2 }
0x15bf   :  { %v1024_v24 = vpop.permute.xlu1 %1023 }
0x15c0   :  { %v1026_v25 = vmul.f32 %v1799_v22, %v1024_v24 }
0x15c2   :  { %1209 = vrot.lane.b32.xlu0 %v1026_v25, %s1913_s2 }
0x15c3   :  { %v1135_v26 = vpop.permute.xlu1 %1134 }
0x15c4   :  { %1624 = vmatmul.mubr.msk.f32.vlgmr.msra.gmra.mrb[12].mxu0 %vm228_vm2, %v1135_v26 }
0x15c5   :  { %1645 = vmatprep.mubr.msk.f32.mxu0 %vm1910_vm1, %v1911_v16  ;;  %1717 = vmatpush3.bf16.msra.mxu0 %v1716_v30  ;;  %v1432_v16 = vld [vmem:[%s2261_s7] ss:$0 sm:$0xff]  ;;  %s1389_s7 = sshll.u32 %s1914_s1, 4  ;;  %s1390_s7 = int_to_ptr.vmem [resolvable:$true] %s1389_s7 }
0x15c6   :  { %1718 = vmatprep.subr.bf16.mxu0 %v1909_v10  ;;  %v1433_v10 = vld [vmem:[%s2263_s9] ss:$0 sm:$0xff]  ;;  %s1876_s2 = scalar_lea.vmem %s1390_s7, 128  ;;  %p1881_p11 = scmp.lt.s32.totalorder %s1390_s7, %s1390_s7 }
0x15c7   :  { %p1877_p10 = scmp.ne.s32.totalorder %s1390_s7, %s1876_s2  ;;  %p1882_p12 = scmp.lt.s32.totalorder %s1876_s2, %s1876_s2 }
0x15c9   :  { %1720 = vmatpush3.bf16.msra.mxu0 %v1719_v33  ;;  %p1883_p13 = por %p1882_p12, %p1881_p11 }
0x15cb   :  { %p1884_p0 = pnand %p1883_p13, %p1877_p10 }
0x1634   :  { %v1210_v27 = vpop.permute.xlu0 %1209 }
0x1635   :  { %1635 = vmatmul.mubr.msk.f32.vlgmr.msra.gmra.mrb[14].mxu1 %vm228_vm2, %v1210_v27 }
0x1697   :  { %v1204_v34 = vpop.f32.mrb[12].mxu0 }
0x1698   :  { %v1625_v35 = vpop.f32.mrb[13].mxu0 }
0x1708   :  { %v1279_v36 = vpop.f32.mrb[14].mxu1 }
0x1709   :  { %v1280_v23 = vadd.f32 %v1279_v36, %v1204_v34  ;;  %v1636_v37 = vpop.f32.mrb[15].mxu1 }
0x170b   :  { %v1290_v38 = vadd.f32 %v1432_v16, %v1280_v23 }
0x170d   :  { %v1291_v39 = vmax.f32 %v1290_v38, 0.0 }
0x170f   :  { %1646 = vmatmul.mubr.msk.f32.vlgmr.msra.gmra.mrb[14].mxu0 %vm228_vm2, %v1291_v39 }
0x17e2   :  { %v1372_v40 = vpop.f32.mrb[14].mxu0 }
0x17e3   :  { %v1373_v41 = vadd.f32 %v1433_v10, %v1372_v40  ;;  %v1647_v42 = vpop.f32.mrb[15].mxu0 }
0x17e5   :  { %v1435_v43 = vmul.f32 -1.442695, %v1373_v41 }
0x17e7   :  { %1806 = vpow2.f32 %v1435_v43 }
0x17f1   :  { %v1807_v44 = vpop.eup %1806 }
0x17f2   :  { %v1379_v45 = vadd.f32 1.0, %v1807_v44 }
0x17f4   :  { %1808 = vrcp.f32 %v1379_v45 }
0x17fe   :  { %v1809_v46 = vpop.eup %1808 }
0x17ff   :  { %1382 = vst [vmem:[#allocation8] sm:$0xff] %v1809_v46 }
0x1800   :  { %1887 = shalt.err (!%p1884_p0)
}
0x1801   :  { %s1888_s11 = scalar_lea.hbm %s2264_s10, 128 }
0x1802   :  { %p1889_p1 = scmp.ne.s32.totalorder %s2264_s10, %s1888_s11  ;;  %p1892_p2 = scmp.lt.u32.totalorder %s1888_s11, %s2264_s10 }
0x1804   :  { %p1894_p3 = pnand %p1892_p2, %p1889_p1 }
0x1806   :  { %1897 = shalt.err (!%p1894_p3)
}
0x1807   :  { %1392 = dma.vmem_to_hbm [thread:$0]  %s1390_s7, 128, %s2264_s10, [#allocation4]  }
0x1808   :  { %1902 = dma.done.wait [#allocation4], 128  }
0x1809   :  { %1903 = vsyncadd [#allocation4], 4294967168 }
0x180a   :  { %1396 = vsyncpa [#allocation3], 1 }
0x180b   :  { %1397 = vsyncpa [#allocation6], 1 }
0x180c   :  { %1398 = vsyncpa [#allocation4], 1 }

</bundles_post_ra>
